<compile_context>
chip_gen: v6e
topology: v6e:2x2x1
jax: 0.10.0
libtpu: 0.0.40
codegen_flags: <defaults>
</compile_context>

<pallas_src>
import functools

import jax
import jax.numpy as jnp
from jax.experimental import pallas as pl
from jax.experimental.pallas import tpu as pltpu

_NEG_BIG = -1e30  # large negative *finite* fill so shifted exp underflows to 0 (NaN-free)


def _ls_ce_kernel(x_ref, t_ref, out_ref, *, n_true, c_true, classes_padded,
                  confidence, smoothing):
    """One (TILE_N, C_pad) logits tile -> one lane-dense block holding the
    tile's partial sum of smoothed per-row losses."""
    x = x_ref[...].astype(jnp.float32)                       # (TN, Cp) f32
    t = t_ref[...]                                           # (TN, 1) int32
    tile_n = x.shape[0]

    # Shared column iota (needed for the target gather; also for the lane mask
    # when the class axis is padded).
    col = jax.lax.broadcasted_iota(jnp.int32, x.shape, 1)    # (TN, Cp)

    if classes_padded:
        # Padded class lanes must not win the max / contribute to exp-sum.
        xm = jnp.where(col < c_true, x, _NEG_BIG)
    else:
        # Fast path: vocab already a multiple of 128 -> no mask work at all.
        xm = x

    # Numerically stable logsumexp.
    m = jnp.max(xm, axis=-1, keepdims=True)                  # (TN, 1)
    lse = jnp.log(jnp.sum(jnp.exp(xm - m), axis=-1, keepdims=True))

    # Class axis is zero-padded by the wrapper, so the unmasked full-width sum
    # already equals the sum over the true classes (saves a full-tile select).
    sum_x = jnp.sum(x, axis=-1, keepdims=True)               # (TN, 1)
    # Gathered target logit (precondition: 0 <= target < C).
    x_t = jnp.sum(jnp.where(col == t, x, 0.0), axis=-1, keepdims=True)

    # logprob_j = x_j - (m + lse)
    nll_loss = m + lse - x_t                                  # -logprob[target]
    smooth_loss = m + lse - sum_x * (1.0 / c_true)            # -mean_j logprob_j
    loss = confidence * nll_loss + smoothing * smooth_loss    # (TN, 1)

    # Zero out batch-padding rows, then reduce this tile to one partial sum.
    row = (jax.lax.broadcasted_iota(jnp.int32, (tile_n, 1), 0)
           + pl.program_id(0) * tile_n)
    tile_sum = jnp.sum(jnp.where(row < n_true, loss, 0.0))

    # Lane-dense (1, 8, 128) store of the partial sum: one unmasked vreg store
    # per grid step instead of TN/8 lane-width-1 masked stores.
    out_ref[...] = jnp.broadcast_to(tile_sum, out_ref.shape)


def _pick_tile_rows(n, c_pad, itemsize):
    """Row-tile size and scoped-VMEM limit, derived from the chip generation."""
    try:
        vmem_cap = int(pltpu.get_tpu_info().vmem_capacity_bytes)
    except Exception:  # no info available -> assume the smallest (v7x per-TC) VMEM
        vmem_cap = 64 * 1024 * 1024
    vmem_limit = (vmem_cap * 3) // 4  # headroom for Mosaic internal scratch

    # Per tile row we must fit: 2 double-buffered input logits blocks plus
    # roughly 4 (TN, C_pad)-sized f32/int32 in-kernel temporaries
    # (f32 cast of x, iota, masked copy, exp).
    bytes_per_row = 2 * c_pad * itemsize + 4 * c_pad * 4
    tn = vmem_limit // bytes_per_row
    tn = max(8, min(1024, (tn // 8) * 8))

    # Keep the "parallel" grid axis at >= 2 steps so both v7x TensorCores get
    # work (one extra ~0.35us grid step on v5e/v6e is negligible).
    if n >= 16:
        tn = min(tn, ((pl.cdiv(n, 2) + 7) // 8) * 8)
    # Never exceed the row-padded batch.
    tn = min(tn, ((n + 7) // 8) * 8)
    return max(tn, 8), int(vmem_limit)


def label_smoothing_cross_entropy(x, target, *, smoothing=0.1, tile_rows=None):
    """x: (N, C) float (f32/bf16) logits, target: (N,) int labels -> scalar f32 mean loss."""
    assert smoothing < 1.0
    n, c = x.shape
    c_pad = pl.cdiv(c, 128) * 128
    itemsize = jnp.dtype(x.dtype).itemsize

    tn_auto, vmem_limit = _pick_tile_rows(n, c_pad, itemsize)
    tn = tile_rows if tile_rows is not None else tn_auto
    n_pad = pl.cdiv(n, tn) * tn
    num_tiles = n_pad // tn

    # TODO(synk): for very large vocabularies (C_pad * 8 rows approaching the
    # VMEM budget, e.g. 128K+ classes on v7x) add a second 'arbitrary' grid
    # axis over class chunks with online max/lse/sum accumulators instead of
    # shrinking the row tile toward 8.

    # Zero-pad classes to a lane-dense width (relied on by the unmasked sum_x)
    # and rows to a whole number of tiles.
    xp = x
    if c_pad != c:
        xp = jnp.pad(xp, ((0, 0), (0, c_pad - c)))
    if n_pad != n:
        xp = jnp.pad(xp, ((0, n_pad - n), (0, 0)))
    t2d = target.astype(jnp.int32).reshape(n, 1)
    if n_pad != n:
        t2d = jnp.pad(t2d, ((0, n_pad - n), (0, 0)))

    kernel = functools.partial(
        _ls_ce_kernel,
        n_true=n,
        c_true=c,
        classes_padded=(c_pad != c),
        confidence=1.0 - smoothing,
        smoothing=smoothing,
    )

    partial_sums = pl.pallas_call(
        kernel,
        out_shape=jax.ShapeDtypeStruct((num_tiles, 8, 128), jnp.float32),
        grid=(num_tiles,),
        in_specs=[
            pl.BlockSpec((tn, c_pad), lambda i: (i, 0)),
            pl.BlockSpec((tn, 1), lambda i: (i, 0)),
        ],
        out_specs=pl.BlockSpec((1, 8, 128), lambda i: (i, 0, 0)),
        compiler_params=pltpu.CompilerParams(
            dimension_semantics=("parallel",),
            vmem_limit_bytes=vmem_limit,
        ),
    )(xp, t2d)

    # reduction='mean' over the true batch (padded rows contribute 0).
    return jnp.sum(partial_sums[:, 0, 0]) / jnp.float32(n)


def _reference(x, target, smoothing=0.1):
    logprobs = jax.nn.log_softmax(x.astype(jnp.float32), axis=-1)
    nll = -jnp.take_along_axis(logprobs, target[:, None], axis=-1)[:, 0]
    smooth = -jnp.mean(logprobs, axis=-1)
    loss = (1.0 - smoothing) * nll + smoothing * smooth
    return jnp.mean(loss)


if __name__ == "__main__":
    keys = jax.random.split(jax.random.PRNGKey(0), 8)

    # 1) Small case exercising class-lane padding (C=32 -> 128).
    N, C = 8, 32
    x = jax.random.normal(keys[0], (N, C), dtype=jnp.float32)
    target = jax.random.randint(keys[1], (N,), 0, C, dtype=jnp.int32)
    loss = label_smoothing_cross_entropy(x, target)
    jax.block_until_ready(loss)
    ref = _reference(x, target)
    assert jnp.allclose(loss, ref, atol=1e-5, rtol=1e-5), (loss, ref)

    # 2) Ragged rows + ragged classes (row-padding and class-lane masking).
    N2, C2 = 10, 40
    x2 = jax.random.normal(keys[2], (N2, C2), dtype=jnp.float32)
    t2 = jax.random.randint(keys[3], (N2,), 0, C2, dtype=jnp.int32)
    loss2 = label_smoothing_cross_entropy(x2, t2)
    jax.block_until_ready(loss2)
    ref2 = _reference(x2, t2)
    assert jnp.allclose(loss2, ref2, atol=1e-5, rtol=1e-5), (loss2, ref2)

    # 3) bf16 logits path (halves HBM traffic for the bandwidth-bound regime).
    xb = x.astype(jnp.bfloat16)
    loss3 = label_smoothing_cross_entropy(xb, target)
    jax.block_until_ready(loss3)
    ref3 = _reference(xb, target)
    assert jnp.allclose(loss3, ref3, atol=1e-4, rtol=1e-4), (loss3, ref3)

    # 4) Lane-exact vocab (C == 128): exercises the specialized no-mask fast
    #    path and a 2-step 'parallel' grid (partial-sum accumulation).
    N4, C4 = 16, 128
    x4 = jax.random.normal(keys[4], (N4, C4), dtype=jnp.float32)
    t4 = jax.random.randint(keys[5], (N4,), 0, C4, dtype=jnp.int32)
    loss4 = label_smoothing_cross_entropy(x4, t4)
    jax.block_until_ready(loss4)
    ref4 = _reference(x4, t4)
    assert jnp.allclose(loss4, ref4, atol=1e-5, rtol=1e-5), (loss4, ref4)

    print("KERNEL_OK")
</pallas_src>

<mosaic_0001>
module attributes {stable_mosaic.version = 11 : i64} {
  func.func @_ls_ce_kernel(%arg0: i32, %arg1: memref<8x128xf32, #tpu.memory_space<vmem>>, %arg2: memref<8x1xi32, #tpu.memory_space<vmem>>, %arg3: memref<1x8x128xf32, #tpu.memory_space<vmem>>) attributes {dimension_semantics = [#tpu.dimension_semantics<parallel>], iteration_bounds = array<i64: 1>, scalar_prefetch = 0 : i64, scratch_operands = 0 : i64, tpu.core_type = #tpu.core_type<tc>, window_params = [{transform_indices = @transform_0, window_bounds = array<i64: 8, 128>}, {transform_indices = @transform_1, window_bounds = array<i64: 8, 1>}, {transform_indices = @transform_2, window_bounds = array<i64: 1, 8, 128>}]} {
    %c0 = arith.constant 0 : index
    %c0_0 = arith.constant 0 : index
    %0 = vector.load %arg1[%c0, %c0_0] : memref<8x128xf32, #tpu.memory_space<vmem>>, vector<8x128xf32>
    %c0_1 = arith.constant 0 : index
    %c0_2 = arith.constant 0 : index
    %1 = vector.load %arg2[%c0_1, %c0_2] : memref<8x1xi32, #tpu.memory_space<vmem>>, vector<8x1xi32>
    %2 = tpu.iota {dimensions = array<i32: 1>} : vector<8x128xi32>
    %c32_i32 = arith.constant 32 : i32
    %3 = vector.broadcast %c32_i32 : i32 to vector<8x128xi32>
    %4 = arith.cmpi slt, %2, %3 : vector<8x128xi32>
    %cst = arith.constant -1.000000e+30 : f32
    %5 = vector.broadcast %cst : f32 to vector<8x128xf32>
    %6 = arith.select %4, %0, %5 : vector<8x128xi1>, vector<8x128xf32>
    %cst_3 = arith.constant dense<0xFF800000> : vector<8xf32>
    %7 = vector.multi_reduction <maximumf>, %6, %cst_3 [1] : vector<8x128xf32> to vector<8xf32>
    %8 = vector.shape_cast %7 : vector<8xf32> to vector<8x1xf32>
    %9 = vector.broadcast %8 : vector<8x1xf32> to vector<8x128xf32>
    %10 = arith.subf %6, %9 : vector<8x128xf32>
    %11 = math.exp %10 : vector<8x128xf32>
    %cst_4 = arith.constant dense<0.000000e+00> : vector<8xf32>
    %12 = vector.multi_reduction <add>, %11, %cst_4 [1] : vector<8x128xf32> to vector<8xf32>
    %13 = vector.shape_cast %12 : vector<8xf32> to vector<8x1xf32>
    %14 = math.log %13 : vector<8x1xf32>
    %cst_5 = arith.constant dense<0.000000e+00> : vector<8xf32>
    %15 = vector.multi_reduction <add>, %0, %cst_5 [1] : vector<8x128xf32> to vector<8xf32>
    %16 = vector.shape_cast %15 : vector<8xf32> to vector<8x1xf32>
    %17 = vector.broadcast %1 : vector<8x1xi32> to vector<8x128xi32>
    %18 = arith.cmpi eq, %2, %17 : vector<8x128xi32>
    %cst_6 = arith.constant 0.000000e+00 : f32
    %19 = vector.broadcast %cst_6 : f32 to vector<8x128xf32>
    %20 = arith.select %18, %0, %19 : vector<8x128xi1>, vector<8x128xf32>
    %cst_7 = arith.constant dense<0.000000e+00> : vector<8xf32>
    %21 = vector.multi_reduction <add>, %20, %cst_7 [1] : vector<8x128xf32> to vector<8xf32>
    %22 = vector.shape_cast %21 : vector<8xf32> to vector<8x1xf32>
    %23 = arith.addf %8, %14 : vector<8x1xf32>
    %24 = arith.subf %23, %22 : vector<8x1xf32>
    %25 = arith.addf %8, %14 : vector<8x1xf32>
    %cst_8 = arith.constant 3.125000e-02 : f32
    %26 = vector.broadcast %cst_8 : f32 to vector<8x1xf32>
    %27 = arith.mulf %16, %26 : vector<8x1xf32>
    %28 = arith.subf %25, %27 : vector<8x1xf32>
    %cst_9 = arith.constant 0.899999976 : f32
    %29 = vector.broadcast %cst_9 : f32 to vector<8x1xf32>
    %30 = arith.mulf %29, %24 : vector<8x1xf32>
    %cst_10 = arith.constant 1.000000e-01 : f32
    %31 = vector.broadcast %cst_10 : f32 to vector<8x1xf32>
    %32 = arith.mulf %31, %28 : vector<8x1xf32>
    %33 = arith.addf %30, %32 : vector<8x1xf32>
    %34 = tpu.iota {dimensions = array<i32: 0>} : vector<8x1xi32>
    %c8_i32 = arith.constant 8 : i32
    %35 = arith.muli %arg0, %c8_i32 : i32
    %36 = vector.broadcast %35 : i32 to vector<8x1xi32>
    %37 = arith.addi %34, %36 : vector<8x1xi32>
    %c8_i32_11 = arith.constant 8 : i32
    %38 = vector.broadcast %c8_i32_11 : i32 to vector<8x1xi32>
    %39 = arith.cmpi slt, %37, %38 : vector<8x1xi32>
    %cst_12 = arith.constant 0.000000e+00 : f32
    %40 = vector.broadcast %cst_12 : f32 to vector<8x1xf32>
    %41 = arith.select %39, %33, %40 : vector<8x1xi1>, vector<8x1xf32>
    %42 = vector.shape_cast %41 : vector<8x1xf32> to vector<1x8x1xf32>
    %cst_13 = arith.constant dense<0.000000e+00> : vector<1xf32>
    %43 = vector.multi_reduction <add>, %42, %cst_13 [1, 2] : vector<1x8x1xf32> to vector<1xf32>
    %44 = vector.shape_cast %43 : vector<1xf32> to vector<1x1x1xf32>
    %45 = vector.extract %44[0, 0, 0] : f32 from vector<1x1x1xf32>
    %46 = vector.broadcast %45 : f32 to vector<1x8x128xf32>
    %c0_14 = arith.constant 0 : index
    %c0_15 = arith.constant 0 : index
    %c0_16 = arith.constant 0 : index
    %47 = vector.load %arg3[%c0_14, %c0_15, %c0_16] : memref<1x8x128xf32, #tpu.memory_space<vmem>>, vector<1x8x128xf32>
    tpu.vector_store %arg3[%c0_14, %c0_15, %c0_16], %46 {strides = array<i32>} : memref<1x8x128xf32, #tpu.memory_space<vmem>>, vector<1x8x128xf32>,
    return
  }
  func.func @transform_0(%arg0: i32) -> (i32, i32) {
    %c0_i32 = arith.constant 0 : i32
    %c0_i32_0 = arith.constant 0 : i32
    return %arg0, %c0_i32 : i32, i32
  }
  func.func @transform_1(%arg0: i32) -> (i32, i32) {
    %c0_i32 = arith.constant 0 : i32
    %c0_i32_0 = arith.constant 0 : i32
    return %arg0, %c0_i32 : i32, i32
  }
  func.func @transform_2(%arg0: i32) -> (i32, i32, i32) {
    %c0_i32 = arith.constant 0 : i32
    %c0_i32_0 = arith.constant 0 : i32
    %c0_i32_1 = arith.constant 0 : i32
    return %arg0, %c0_i32, %c0_i32_0 : i32, i32, i32
  }
}

</mosaic_0001>

<bundles_post_ra>
// kernel: tpu_custom_call.1
= control target key start
LH: loop header
LB: loop body
LE: loop exit
PB: predicated region body
PF: predicated region fallthrough
CT: control target
= control target key end

     0   :  { %v14_v0 = vlaneseq  ;;  %s134_s0 = inlined_call_operand.vmem [shape: f32[8,128], index: 0, kind: input, shape index: {}]   ;;  %s135_s1 = inlined_call_operand.vmem [shape: s32[8,1], index: 1, kind: input, shape index: {}]   ;;  %s136_s2 = inlined_call_operand.hbm [shape: f32[1,8,128], index: 2, kind: output, shape index: {}]  }
   0x1   :  { %7 = vsyncpa [#allocation3], 0  ;;  %v108_v1 = vmov 0   ;;  %v12_v2 = vld [vmem:[%s134_s0] sm:$0xff]  ;;  %vm50_vm2 = vcmask 7168   ;;  %s109_s0 = smov [#allocation2]  }
   0x2   :  { %81 = vset.pattern.permute.xlu0 %v108_v1  ;;  %v15_v3 = vand.u32 127, %v14_v0  ;;  %v13_v5 = vld [vmem:[%s135_s1] sm:$0xff]  ;;  %s69_s1 = sshll.u32 %s109_s0, 4  ;;  %s70_s1 = int_to_ptr.vmem [resolvable:$true] %s69_s1 }
   0x3   :  { %s86_s14 = scalar_lea.vmem %s70_s1, 128  ;;  %p91_p1 = scmp.lt.s32.totalorder %s70_s1, %s70_s1 }
   0x4   :  { %vm16_vm0 = vcmp.lt.s32.totalorder %v15_v3, 32  ;;  %p87_p0 = scmp.ne.s32.totalorder %s70_s1, %s86_s14  ;;  %p92_p2 = scmp.lt.s32.totalorder %s86_s14, %s86_s14 }
   0x5   :  { %v17_v4 = vsel %vm16_vm0, %v12_v2, -1e+30 }
   0x6   :  { %18 = vmax.xlane.f32.xlu0 %v17_v4  ;;  %p93_p3 = por %p92_p2, %p91_p1 }
   0x8   :  { %p94_p4 = pnand %p93_p3, %p87_p0 }
  0x1c   :  { %30 = vperm.xlu0 %81, %v13_v5  }
  0x8f   :  { %v19_v6 = vpop.xlane.xlu0 %18 }
  0x90   :  { %v20_v7 = vsub.f32 %v17_v4, %v19_v6 }
  0x92   :  { %v21_v8 = vmul.f32 1.442695, %v20_v7 }
  0x94   :  { %82 = vpow2.f32 %v21_v8 }
  0x97   :  { %v31_v10 = vpop.permute.xlu0 %30 }
  0x98   :  { %vm32_vm1 = vcmp.eq.s32.totalorder %v15_v3, %v31_v10 }
  0x99   :  { %v33_v11 = vsel %vm32_vm1, %v12_v2, 0.0 }
  0xa1   :  { %v83_v9 = vpop.eup %82 }
  0xa2   :  { %23 = vadd.xlane.f32.xlu1 %v83_v9 }
  0xa6   :  { %27 = vadd.xlane.f32.xlu1 %v12_v2 }
  0xaa   :  { %34 = vadd.xlane.f32.xlu1 %v33_v11 }
 0x12b   :  { %v24_v12 = vpop.xlane.xlu1 %23 }
 0x12c   :  { %84 = vlog2.f32 %v24_v12 }
 0x12f   :  { %v28_v13 = vpop.xlane.xlu1 %27 }
 0x130   :  { %v38_v18 = vmul.f32 0.03125, %v28_v13 }
 0x133   :  { %v35_v16 = vpop.xlane.xlu1 %34 }
 0x139   :  { %v85_v14 = vpop.eup %84 }
 0x13a   :  { %v26_v15 = vmul.f32 0.6931472, %v85_v14 }
 0x13c   :  { %v36_v17 = vadd.f32 %v26_v15, %v19_v6 }
 0x13e   :  { %v39_v19 = vsub.f32 %v36_v17, %v38_v18  ;;  %v37_v20 = vsub.f32 %v36_v17, %v35_v16 }
 0x140   :  { %v41_v21 = vmul.f32 0.1, %v39_v19  ;;  %v40_v22 = vmul.f32 0.9, %v37_v20 }
 0x142   :  { %v42_v23 = vadd.f32 %v41_v21, %v40_v22 }
 0x144   :  { %v51_v24 = vsel %vm50_vm2, %v42_v23, 0.0 }
 0x145   :  { %52 = vadd.xlane.f32.xlu1 %v51_v24 }
 0x1ce   :  { %v53_v25 = vpop.xlane.xlu1 %52 }
 0x1cf   :  { %v54_v26 = vrot.slane %v53_v25, 4 }
 0x1d1   :  { %v55_v27 = vadd.f32 %v54_v26, %v53_v25 }
 0x1d3   :  { %v56_v28 = vrot.slane %v55_v27, 2 }
 0x1d5   :  { %v57_v29 = vadd.f32 %v56_v28, %v55_v27 }
 0x1d7   :  { %v58_v30 = vrot.slane %v57_v29, 1 }
 0x1d9   :  { %v59_v31 = vadd.f32 %v58_v30, %v57_v29 }
 0x1db   :  { %77 = vpush %v59_v31 }
 0x20c   :  { %s78_s13 = spop %77 }
 0x20d   :  { %v61_v32 = vstv %s78_s13 }
 0x20e   :  { %62 = vst [vmem:[#allocation2] sm:$0xff] %v61_v32 }
 0x20f   :  { %97 = shalt.err (!%p94_p4)
}
 0x210   :  { %72 = dma.vmem_to_hbm [thread:$0]  %s70_s1, 128, %s136_s2, [#allocation3]  }
 0x211   :  { %106 = dma.done.wait [#allocation3], 128  }
 0x212   :  { %107 = vsyncadd [#allocation3], 4294967168 }
 0x213   :  { %76 = vsyncpa [#allocation3], 1 }

</bundles_post_ra>
